<compile_context>
chip_gen: v6e
topology: v6e:2x2x1
jax: 0.10.0
libtpu: 0.0.40
codegen_flags: <defaults>
</compile_context>

<pallas_src>
import jax
import jax.numpy as jnp
from jax.experimental import pallas as pl
from jax.experimental.pallas import tpu as pltpu


def _round_up(x, m):
    return ((x + m - 1) // m) * m


def _cdiv(a, b):
    return -(-a // b)


# ----------------------------------------------------------------------------
# Pallas kernel: fused  concat -> Linear(512,256)+ReLU -> Linear(256,128p)+ReLU
#                        -> Linear(128p, OUT_PAD)      (output lane-padded, bf16)
# ----------------------------------------------------------------------------
def gnnet_fc_kernel(x1_ref, x2_ref,
                    w1_ref, b1_ref,
                    w2_ref, b2_ref,
                    w3_ref, b3_ref,
                    o_ref):
    # Build bf16 [x1 || x2] in VMEM (cast happens here; no wrapper cast pass).
    x = jnp.concatenate([x1_ref[...].astype(jnp.bfloat16),
                         x2_ref[...].astype(jnp.bfloat16)], axis=-1)  # (TM, 512)

    # Layer 1: single K=512 dot, f32 MXU accumulation; bias/ReLU in f32.
    h1 = jnp.dot(x, w1_ref[...], preferred_element_type=jnp.float32) + b1_ref[...]
    h1 = jnp.maximum(h1, 0.0)                   # ReLU (Dropout -> identity, eval)

    # Layer 2: Linear(256, 128-padded) + ReLU  (padded cols are exactly zero).
    h2 = jnp.dot(h1.astype(jnp.bfloat16), w2_ref[...],
                 preferred_element_type=jnp.float32) + b2_ref[...]
    h2 = jnp.maximum(h2, 0.0)                   # ReLU (Dropout -> identity, eval)

    # Layer 3: Linear(128-padded, OUT_PAD); store lane-dense bf16 slab.
    out = jnp.dot(h2.astype(jnp.bfloat16), w3_ref[...],
                  preferred_element_type=jnp.float32) + b3_ref[...]
    o_ref[...] = out.astype(o_ref.dtype)


def gnnet_fc(x1, x2, params):
    """Run the fused FC head.  x1, x2: (B, 256) float32 -> (B, n_classes) f32."""
    B = x1.shape[0]
    n_classes = params["b3"].shape[-1]
    h2_dim = params["w2"].shape[-1]                     # 64 in the reference model
    OUT_PAD = _round_up(max(n_classes, 128), 128)       # lane-dense output width
    H2_PAD = _round_up(max(h2_dim, 128), 128)           # lane-dense hidden-2 width

    # ---- batch tile selection -------------------------------------------------
    # Big tiles amortize the ~0.35 us per-step overhead; for larger batches pick
    # an even (>=2) tile count so the "parallel" grid axis can shard over both
    # v7x TensorCores.  No row padding: the grid is cdiv(B, TM) and Pallas masks
    # the partial last tile.
    TM_CAP = 1024
    if B <= 32:
        TM = _round_up(max(B, 8), 16)
    else:
        tiles = max(2, _cdiv(B, TM_CAP))
        if tiles % 2:
            tiles += 1                                   # even split for v7x 2-TC
        TM = min(TM_CAP, _round_up(_cdiv(B, tiles), 16))
    grid_m = _cdiv(B, TM)

    # ---- weight prep (tiny arrays; bf16 matmul operands, f32 biases) ---------
    w1 = params["w1"].astype(jnp.bfloat16)                                   # (512, 256)
    b1 = params["b1"].astype(jnp.float32)                                    # (1, 256)
    w2 = jnp.pad(params["w2"], ((0, 0), (0, H2_PAD - h2_dim))).astype(jnp.bfloat16)
    b2 = jnp.pad(params["b2"], ((0, 0), (0, H2_PAD - h2_dim))).astype(jnp.float32)
    w3 = jnp.pad(params["w3"],
                 ((0, H2_PAD - h2_dim), (0, OUT_PAD - n_classes))).astype(jnp.bfloat16)
    b3 = jnp.pad(params["b3"], ((0, 0), (0, OUT_PAD - n_classes))).astype(jnp.float32)

    resident = lambda i: (0, 0)                          # weights/biases stay in VMEM
    tile_row = lambda i: (i, 0)                          # batch-tiled operands

    out = pl.pallas_call(
        gnnet_fc_kernel,
        out_shape=jax.ShapeDtypeStruct((B, OUT_PAD), jnp.bfloat16),
        grid=(grid_m,),
        in_specs=[
            pl.BlockSpec((TM, 256), tile_row),           # x1 (f32, cast in-kernel)
            pl.BlockSpec((TM, 256), tile_row),           # x2 (f32, cast in-kernel)
            pl.BlockSpec((512, 256), resident),          # W1
            pl.BlockSpec((1, 256), resident),            # b1
            pl.BlockSpec((256, H2_PAD), resident),       # W2 (lane-padded)
            pl.BlockSpec((1, H2_PAD), resident),         # b2 (lane-padded)
            pl.BlockSpec((H2_PAD, OUT_PAD), resident),   # W3 (padded)
            pl.BlockSpec((1, OUT_PAD), resident),        # b3 (padded)
        ],
        out_specs=pl.BlockSpec((TM, OUT_PAD), tile_row),
        compiler_params=pltpu.CompilerParams(
            dimension_semantics=("parallel",),           # shard batch tiles over TCs
            vmem_limit_bytes=32 * 1024 * 1024,           # headroom on v5e (default 16 MiB)
        ),
    )(x1.astype(jnp.float32), x2.astype(jnp.float32), w1, b1, w2, b2, w3, b3)

    return out[:, :n_classes].astype(jnp.float32)


# ----------------------------------------------------------------------------
# Deterministic parameter initialization (synthetic; no checkpoint loading).
# Weights stored as (in_dim, out_dim) so y = x @ W  (== torch weight transposed).
# ----------------------------------------------------------------------------
def init_params(key, n_classes=2):
    ks = jax.random.split(key, 8)

    def lin(k, fan_in, fan_out):
        scale = 1.0 / jnp.sqrt(fan_in)
        return jax.random.uniform(k, (fan_in, fan_out), jnp.float32, -scale, scale)

    return {
        "w1": lin(ks[0], 512, 256),
        "b1": jax.random.uniform(ks[1], (1, 256), jnp.float32, -0.04, 0.04),
        "w2": lin(ks[2], 256, 64),
        "b2": jax.random.uniform(ks[3], (1, 64), jnp.float32, -0.06, 0.06),
        "w3": lin(ks[4], 64, n_classes),
        "b3": jax.random.uniform(ks[5], (1, n_classes), jnp.float32, -0.12, 0.12),
        # stand-in branch projections (see branch stubs below)
        "wb1": jax.random.normal(ks[6], (6, 256), jnp.float32) * 0.1,
        "wb2": jax.random.normal(ks[7], (1, 256), jnp.float32) * 0.1,
    }


# ----------------------------------------------------------------------------
# Branch stand-ins (plain JAX glue).
# TODO(synk): Net_b1 / Net_b2 definitions are not present in the provided
# source; these deterministic pooled-linear stand-ins only reproduce the
# output shapes ((B, 256) each), not the original branch computation.
# ----------------------------------------------------------------------------
def branch1_stub(pos, norm, batch, wb1, B):
    feats = jnp.concatenate([pos, norm], axis=-1)                            # (N, 6)
    counts = jax.ops.segment_sum(jnp.ones((feats.shape[0],)), batch, num_segments=B)
    counts = jnp.maximum(counts, 1.0)                                        # empty-segment guard
    pooled = jax.ops.segment_sum(feats, batch, num_segments=B) / counts[:, None]
    return pooled @ wb1                                                      # (B, 256)


def branch2_stub(cube, wb2):
    pooled = jnp.mean(cube, axis=(1, 2, 3, 4), keepdims=False)[:, None]      # (B, 1)
    return pooled @ wb2                                                      # (B, 256)


# ----------------------------------------------------------------------------
# Full forward (inference / eval mode: Dropout == identity)
# ----------------------------------------------------------------------------
def gnnet_forward(pos, norm, batch, cube, params, B):
    x1 = branch1_stub(pos, norm, batch, params["wb1"], B).astype(jnp.float32)
    x2 = branch2_stub(cube, params["wb2"]).astype(jnp.float32)
    return gnnet_fc(x1, x2, params)


# Pure-JAX references of the FC head for sanity checks.
def _fc_reference_f32(x1, x2, params):
    x = jnp.concatenate([x1, x2], axis=-1)
    h1 = jnp.maximum(x @ params["w1"] + params["b1"], 0.0)
    h2 = jnp.maximum(h1 @ params["w2"] + params["b2"], 0.0)
    return h2 @ params["w3"] + params["b3"]


def _fc_reference_bf16(x1, x2, params):
    # Emulates the kernel's exact precision scheme (bf16 operands, f32 accum,
    # f32 bias/ReLU, bf16 output store) so the tolerance can be tight.
    bf = jnp.bfloat16
    x = jnp.concatenate([x1.astype(bf), x2.astype(bf)], axis=-1)
    h1 = jnp.dot(x, params["w1"].astype(bf),
                 preferred_element_type=jnp.float32) + params["b1"]
    h1 = jnp.maximum(h1, 0.0)
    h2 = jnp.dot(h1.astype(bf), params["w2"].astype(bf),
                 preferred_element_type=jnp.float32) + params["b2"]
    h2 = jnp.maximum(h2, 0.0)
    out = jnp.dot(h2.astype(bf), params["w3"].astype(bf),
                  preferred_element_type=jnp.float32) + params["b3"]
    return out.astype(bf).astype(jnp.float32)


if __name__ == "__main__":
    key = jax.random.PRNGKey(0)
    k_params, k_pos, k_norm, k_cube = jax.random.split(key, 4)

    B = 2                 # batch size
    N_PER = 8             # points per sample
    N = B * N_PER
    n_classes = 2

    params = init_params(k_params, n_classes=n_classes)

    pos = jax.random.normal(k_pos, (N, 3), jnp.float32)
    norm = jax.random.normal(k_norm, (N, 3), jnp.float32)
    batch = jnp.repeat(jnp.arange(B, dtype=jnp.int32), N_PER)          # (N,)
    cube = jax.random.normal(k_cube, (B, 1, 16, 16, 16), jnp.float32)  # NCDHW

    logits = gnnet_forward(pos, norm, batch, cube, params, B)
    jax.block_until_ready(logits)

    assert logits.shape == (B, n_classes), logits.shape
    assert logits.dtype == jnp.float32

    x1 = branch1_stub(pos, norm, batch, params["wb1"], B)
    x2 = branch2_stub(cube, params["wb2"])

    # Tight check vs. a bf16-emulating reference (same precision scheme).
    ref_bf16 = _fc_reference_bf16(x1, x2, params)
    assert jnp.allclose(logits, ref_bf16, rtol=2e-2, atol=2e-2), (logits, ref_bf16)

    # Loose sanity check vs. a pure f32 reference.
    ref_f32 = _fc_reference_f32(x1, x2, params)
    assert jnp.allclose(logits, ref_f32, rtol=1e-1, atol=1e-1), (logits, ref_f32)

    print("KERNEL_OK")
</pallas_src>

<mosaic_0001>
module attributes {stable_mosaic.version = 11 : i64} {
  func.func @gnnet_fc_kernel(%arg0: i32, %arg1: memref<16x256xf32, #tpu.memory_space<vmem>>, %arg2: memref<16x256xf32, #tpu.memory_space<vmem>>, %arg3: memref<512x256xbf16, #tpu.memory_space<vmem>>, %arg4: memref<1x256xf32, #tpu.memory_space<vmem>>, %arg5: memref<256x128xbf16, #tpu.memory_space<vmem>>, %arg6: memref<1x128xf32, #tpu.memory_space<vmem>>, %arg7: memref<128x128xbf16, #tpu.memory_space<vmem>>, %arg8: memref<1x128xf32, #tpu.memory_space<vmem>>, %arg9: memref<16x128xbf16, #tpu.memory_space<vmem>>) attributes {dimension_semantics = [#tpu.dimension_semantics<parallel>], iteration_bounds = array<i64: 1>, scalar_prefetch = 0 : i64, scratch_operands = 0 : i64, tpu.core_type = #tpu.core_type<tc>, window_params = [{transform_indices = @transform_0, window_bounds = array<i64: 16, 256>}, {transform_indices = @transform_1, window_bounds = array<i64: 16, 256>}, {pipeline_mode = #tpu.pipeline_mode<synchronous>, transform_indices = @transform_2, window_bounds = array<i64: 512, 256>}, {pipeline_mode = #tpu.pipeline_mode<synchronous>, transform_indices = @transform_3, window_bounds = array<i64: 1, 256>}, {pipeline_mode = #tpu.pipeline_mode<synchronous>, transform_indices = @transform_4, window_bounds = array<i64: 256, 128>}, {pipeline_mode = #tpu.pipeline_mode<synchronous>, transform_indices = @transform_5, window_bounds = array<i64: 1, 128>}, {pipeline_mode = #tpu.pipeline_mode<synchronous>, transform_indices = @transform_6, window_bounds = array<i64: 128, 128>}, {pipeline_mode = #tpu.pipeline_mode<synchronous>, transform_indices = @transform_7, window_bounds = array<i64: 1, 128>}, {transform_indices = @transform_8, window_bounds = array<i64: 16, 128>}]} {
    %c0 = arith.constant 0 : index
    %c0_0 = arith.constant 0 : index
    %0 = vector.load %arg1[%c0, %c0_0] : memref<16x256xf32, #tpu.memory_space<vmem>>, vector<16x256xf32>
    %1 = arith.truncf %0 : vector<16x256xf32> to vector<16x256xbf16>
    %c0_1 = arith.constant 0 : index
    %c0_2 = arith.constant 0 : index
    %2 = vector.load %arg2[%c0_1, %c0_2] : memref<16x256xf32, #tpu.memory_space<vmem>>, vector<16x256xf32>
    %3 = arith.truncf %2 : vector<16x256xf32> to vector<16x256xbf16>
    %4 = tpu.concatenate %1, %3 in 1 : vector<16x256xbf16>, vector<16x256xbf16> -> vector<16x512xbf16>
    %c0_3 = arith.constant 0 : index
    %c0_4 = arith.constant 0 : index
    %5 = vector.load %arg3[%c0_3, %c0_4] : memref<512x256xbf16, #tpu.memory_space<vmem>>, vector<512x256xbf16>
    %cst = arith.constant dense<0.000000e+00> : vector<16x256xf32>
    %6 = tpu.matmul %4, %5, %cst {dimension_numbers = #tpu.dot_dimension_numbers<[1], [0], [0], [1], [0, 0, 1, 1], [], []>} : vector<16x512xbf16>, vector<512x256xbf16>, vector<16x256xf32> -> vector<16x256xf32>
    %c0_5 = arith.constant 0 : index
    %c0_6 = arith.constant 0 : index
    %7 = vector.load %arg4[%c0_5, %c0_6] : memref<1x256xf32, #tpu.memory_space<vmem>>, vector<1x256xf32>
    %8 = vector.broadcast %7 : vector<1x256xf32> to vector<16x256xf32>
    %9 = arith.addf %6, %8 : vector<16x256xf32>
    %cst_7 = arith.constant 0.000000e+00 : f32
    %10 = vector.broadcast %cst_7 : f32 to vector<16x256xf32>
    %11 = arith.maximumf %9, %10 : vector<16x256xf32>
    %12 = arith.truncf %11 : vector<16x256xf32> to vector<16x256xbf16>
    %c0_8 = arith.constant 0 : index
    %c0_9 = arith.constant 0 : index
    %13 = vector.load %arg5[%c0_8, %c0_9] : memref<256x128xbf16, #tpu.memory_space<vmem>>, vector<256x128xbf16>
    %cst_10 = arith.constant dense<0.000000e+00> : vector<16x128xf32>
    %14 = tpu.matmul %12, %13, %cst_10 {dimension_numbers = #tpu.dot_dimension_numbers<[1], [0], [0], [1], [0, 0, 1, 1], [], []>} : vector<16x256xbf16>, vector<256x128xbf16>, vector<16x128xf32> -> vector<16x128xf32>
    %c0_11 = arith.constant 0 : index
    %c0_12 = arith.constant 0 : index
    %15 = vector.load %arg6[%c0_11, %c0_12] : memref<1x128xf32, #tpu.memory_space<vmem>>, vector<1x128xf32>
    %16 = vector.broadcast %15 : vector<1x128xf32> to vector<16x128xf32>
    %17 = arith.addf %14, %16 : vector<16x128xf32>
    %cst_13 = arith.constant 0.000000e+00 : f32
    %18 = vector.broadcast %cst_13 : f32 to vector<16x128xf32>
    %19 = arith.maximumf %17, %18 : vector<16x128xf32>
    %20 = arith.truncf %19 : vector<16x128xf32> to vector<16x128xbf16>
    %c0_14 = arith.constant 0 : index
    %c0_15 = arith.constant 0 : index
    %21 = vector.load %arg7[%c0_14, %c0_15] : memref<128x128xbf16, #tpu.memory_space<vmem>>, vector<128x128xbf16>
    %cst_16 = arith.constant dense<0.000000e+00> : vector<16x128xf32>
    %22 = tpu.matmul %20, %21, %cst_16 {dimension_numbers = #tpu.dot_dimension_numbers<[1], [0], [0], [1], [0, 0, 1, 1], [], []>} : vector<16x128xbf16>, vector<128x128xbf16>, vector<16x128xf32> -> vector<16x128xf32>
    %c0_17 = arith.constant 0 : index
    %c0_18 = arith.constant 0 : index
    %23 = vector.load %arg8[%c0_17, %c0_18] : memref<1x128xf32, #tpu.memory_space<vmem>>, vector<1x128xf32>
    %24 = vector.broadcast %23 : vector<1x128xf32> to vector<16x128xf32>
    %25 = arith.addf %22, %24 : vector<16x128xf32>
    %26 = arith.truncf %25 : vector<16x128xf32> to vector<16x128xbf16>
    %c0_19 = arith.constant 0 : index
    %c0_20 = arith.constant 0 : index
    %27 = vector.load %arg9[%c0_19, %c0_20] : memref<16x128xbf16, #tpu.memory_space<vmem>>, vector<16x128xbf16>
    tpu.vector_store %arg9[%c0_19, %c0_20], %26 {strides = array<i32>} : memref<16x128xbf16, #tpu.memory_space<vmem>>, vector<16x128xbf16>,
    return
  }
  func.func @transform_0(%arg0: i32) -> (i32, i32) {
    %c0_i32 = arith.constant 0 : i32
    %c0_i32_0 = arith.constant 0 : i32
    return %arg0, %c0_i32 : i32, i32
  }
  func.func @transform_1(%arg0: i32) -> (i32, i32) {
    %c0_i32 = arith.constant 0 : i32
    %c0_i32_0 = arith.constant 0 : i32
    return %arg0, %c0_i32 : i32, i32
  }
  func.func @transform_2(%arg0: i32) -> (i32, i32) {
    %c0_i32 = arith.constant 0 : i32
    %c0_i32_0 = arith.constant 0 : i32
    %c0_i32_1 = arith.constant 0 : i32
    return %c0_i32, %c0_i32_0 : i32, i32
  }
  func.func @transform_3(%arg0: i32) -> (i32, i32) {
    %c0_i32 = arith.constant 0 : i32
    %c0_i32_0 = arith.constant 0 : i32
    %c0_i32_1 = arith.constant 0 : i32
    return %c0_i32, %c0_i32_0 : i32, i32
  }
  func.func @transform_4(%arg0: i32) -> (i32, i32) {
    %c0_i32 = arith.constant 0 : i32
    %c0_i32_0 = arith.constant 0 : i32
    %c0_i32_1 = arith.constant 0 : i32
    return %c0_i32, %c0_i32_0 : i32, i32
  }
  func.func @transform_5(%arg0: i32) -> (i32, i32) {
    %c0_i32 = arith.constant 0 : i32
    %c0_i32_0 = arith.constant 0 : i32
    %c0_i32_1 = arith.constant 0 : i32
    return %c0_i32, %c0_i32_0 : i32, i32
  }
  func.func @transform_6(%arg0: i32) -> (i32, i32) {
    %c0_i32 = arith.constant 0 : i32
    %c0_i32_0 = arith.constant 0 : i32
    %c0_i32_1 = arith.constant 0 : i32
    return %c0_i32, %c0_i32_0 : i32, i32
  }
  func.func @transform_7(%arg0: i32) -> (i32, i32) {
    %c0_i32 = arith.constant 0 : i32
    %c0_i32_0 = arith.constant 0 : i32
    %c0_i32_1 = arith.constant 0 : i32
    return %c0_i32, %c0_i32_0 : i32, i32
  }
  func.func @transform_8(%arg0: i32) -> (i32, i32) {
    %c0_i32 = arith.constant 0 : i32
    %c0_i32_0 = arith.constant 0 : i32
    return %arg0, %c0_i32 : i32, i32
  }
}

</mosaic_0001>

<bundles_post_ra>
// kernel: tpu_custom_call.1
= control target key start
LH: loop header
LB: loop body
LE: loop exit
PB: predicated region body
PF: predicated region fallthrough
CT: control target
= control target key end

     0   :  { %13 = vsyncpa [#allocation3], 0  ;;  %s1610_s0 = inlined_call_operand.hbm [shape: f32[2,256], index: 0, kind: input, shape index: {}]   ;;  %s1611_s1 = inlined_call_operand.hbm [shape: f32[2,256], index: 1, kind: input, shape index: {}]   ;;  %s1612_s2 = inlined_call_operand.hbm [shape: bf16[512,256], index: 2, kind: input, shape index: {}]   ;;  %s1613_s3 = inlined_call_operand.vmem [shape: f32[1,256], index: 3, kind: input, shape index: {}]   ;;  %s1614_s4 = inlined_call_operand.hbm [shape: bf16[256,128], index: 4, kind: input, shape index: {}]   ;;  %s1615_s5 = inlined_call_operand.vmem [shape: f32[1,128], index: 5, kind: input, shape index: {}]   ;;  %s1616_s6 = inlined_call_operand.hbm [shape: bf16[128,128], index: 6, kind: input, shape index: {}]   ;;  %s1617_s7 = inlined_call_operand.vmem [shape: f32[1,128], index: 7, kind: input, shape index: {}]   ;;  %s1618_s8 = inlined_call_operand.hbm [shape: bf16[2,128], index: 8, kind: output, shape index: {}]  }
   0x1   :  { %14 = vsyncpa [#allocation6], 0 }
   0x2   :  { %15 = vsyncpa [#allocation9], 0 }
   0x3   :  { %16 = vsyncpa [#allocation4], 0 }
   0x4   :  { %21 = vsyncadd [#allocation3], 448  ;;  %s1506_s27 = smov [#allocation2]  }
   0x5   :  { %s22_s28 = sshll.u32 %s1506_s27, 4  ;;  %s23_s28 = int_to_ptr.vmem [resolvable:$true] %s22_s28 }
   0x6   :  { %s1386_s29 = scalar_lea.vmem %s23_s28, 64  ;;  %s1390_s30 = scalar_lea.vmem %s23_s28, 512 }
   0x7   :  { %p1387_p0 = scmp.ne.s32.totalorder %s23_s28, %s1386_s29  ;;  %p1391_p1 = scmp.lt.s32.totalorder %s23_s28, %s23_s28 }
   0x8   :  { %p1392_p2 = scmp.lt.s32.totalorder %s1390_s30, %s1386_s29 }
   0xa   :  { %p1393_p3 = por %p1392_p2, %p1391_p1 }
   0xc   :  { %p1394_p4 = pnand %p1393_p3, %p1387_p0 }
   0xe   :  { %1397 = shalt.err (!%p1394_p4)
}
   0xf   :  { %s1507_s9 = smov 64   ;;  %s1508_s10 = smov 4  }
  0x10   :  { %28 = dma.hbm_to_vmem [thread:$0]  %s1610_s0, 64, %s23_s28, [#allocation3], %s1507_s9, %s1507_s9, %s1508_s10  }
  0x11   :  { %33 = vsyncadd [#allocation6], 448  ;;  %s1509_s13 = smov [#allocation5]   ;;  %s1510_s15 = smov [#allocation8]  }
  0x12   :  { %s34_s14 = sshll.u32 %s1509_s13, 4  ;;  %s60_s16 = sshll.u32 %s1510_s15, 4  ;;  %s35_s14 = int_to_ptr.vmem [resolvable:$true] %s34_s14  ;;  %s61_s16 = int_to_ptr.vmem [resolvable:$true] %s60_s16 }
  0x13   :  { %s1406_s17 = scalar_lea.vmem %s35_s14, 64  ;;  %s1410_s18 = scalar_lea.vmem %s35_s14, 512 }
  0x14   :  { %p1407_p5 = scmp.ne.s32.totalorder %s35_s14, %s1406_s17  ;;  %p1411_p6 = scmp.lt.s32.totalorder %s35_s14, %s35_s14 }
  0x15   :  { %p1412_p7 = scmp.lt.s32.totalorder %s1410_s18, %s1406_s17 }
  0x17   :  { %p1413_p8 = por %p1412_p7, %p1411_p6 }
  0x19   :  { %p1414_p9 = pnand %p1413_p8, %p1407_p5 }
  0x1b   :  { %1417 = shalt.err (!%p1414_p9)
}
  0x1c   :  { %40 = dma.hbm_to_vmem [thread:$0]  %s1611_s1, 64, %s35_s14, [#allocation6], %s1507_s9, %s1507_s9, %s1508_s10  }
  0x1d   :  { %s1426_s20 = scalar_lea.vmem %s61_s16, 2048  ;;  %p1431_p11 = scmp.lt.s32.totalorder %s61_s16, %s61_s16 }
  0x1e   :  { %p1427_p10 = scmp.ne.s32.totalorder %s61_s16, %s1426_s20  ;;  %p1432_p12 = scmp.lt.s32.totalorder %s1426_s20, %s1426_s20 }
  0x20   :  { %p1433_p13 = por %p1432_p12, %p1431_p11 }
  0x22   :  { %p1434_p0 = pnand %p1433_p13, %p1427_p10 }
  0x24   :  { %1437 = shalt.err (!%p1434_p0)
}
  0x25   :  { %66 = dma.hbm_to_vmem [thread:$0]  %s1614_s4, 2048, %s61_s16, [#allocation9], %s1507_s9, %s1507_s9, %s1508_s10  }
  0x26   :  { %s1511_s23 = smov [#allocation7]  }
  0x27   :  { %s46_s24 = sshll.u32 %s1511_s23, 4  ;;  %s47_s24 = int_to_ptr.vmem [resolvable:$true] %s46_s24 }
  0x28   :  { %s1446_s25 = scalar_lea.vmem %s47_s24, 8192  ;;  %p1451_p2 = scmp.lt.s32.totalorder %s47_s24, %s47_s24 }
  0x29   :  { %p1447_p1 = scmp.ne.s32.totalorder %s47_s24, %s1446_s25  ;;  %p1452_p3 = scmp.lt.s32.totalorder %s1446_s25, %s1446_s25 }
  0x2b   :  { %p1453_p4 = por %p1452_p3, %p1451_p2 }
  0x2d   :  { %p1454_p5 = pnand %p1453_p4, %p1447_p1 }
  0x2f   :  { %1457 = shalt.err (!%p1454_p5)
}
  0x30   :  { %s1512_s1 = smov 128   ;;  %s1513_s26 = smov 8  }
  0x31   :  { %52 = dma.hbm_to_vmem [thread:$0]  %s1612_s2, 8192, %s47_s24, [#allocation6], %s1512_s1, %s1512_s1, %s1513_s26  }
  0x32   :  { %s1514_s29 = smov [#allocation10]  }
  0x33   :  { %s74_s30 = sshll.u32 %s1514_s29, 4  ;;  %s75_s30 = int_to_ptr.vmem [resolvable:$true] %s74_s30 }
  0x34   :  { %s1466_s4 = scalar_lea.vmem %s75_s30, 1024  ;;  %p1471_p7 = scmp.lt.s32.totalorder %s75_s30, %s75_s30 }
  0x35   :  { %p1467_p6 = scmp.ne.s32.totalorder %s75_s30, %s1466_s4  ;;  %p1472_p8 = scmp.lt.s32.totalorder %s1466_s4, %s1466_s4 }
  0x37   :  { %p1473_p9 = por %p1472_p8, %p1471_p7 }
  0x39   :  { %p1474_p10 = pnand %p1473_p9, %p1467_p6 }
  0x3b   :  { %1477 = shalt.err (!%p1474_p10)
}
  0x3c   :  { %80 = dma.hbm_to_vmem [thread:$0]  %s1616_s6, 1024, %s75_s30, [#allocation9], %s1507_s9, %s1507_s9, %s1508_s10  }
  0x3d   :  { %1498 = dma.done.wait [#allocation3], 512  }
  0x3e   :  { %1499 = vsyncadd [#allocation3], 4294966784 }
  0x3f   :  { %1500 = dma.done.wait [#allocation6], 8704  }
  0x40   :  { %1501 = vsyncadd [#allocation6], 4294958592 }
  0x41   :  { %1502 = dma.done.wait [#allocation9], 3072  }
  0x42   :  { %1503 = vsyncadd [#allocation9], 4294964224  ;;  %v1242_v0 = vld [vmem:[#allocation7 + $0x74] ss:$8 sps:$4 sm:$0xff]   ;;  %v1246_v2 = vld [vmem:[#allocation7 + $0x70] ss:$8 sps:$4 sm:$0xff]   ;;  %v120_v39 = vlaneseq }
  0x43   :  { %v1244_v1 = vld [vmem:[#allocation7 + $0x174] ss:$8 sps:$4 sm:$0xff]   ;;  %611 = vmatprep.subr.bf16.mxu0 %v1242_v0  ;;  %v1247_v3 = vld [vmem:[#allocation7 + $0x170] ss:$8 sps:$4 sm:$0xff]   ;;  %v1248_v4 = vld [vmem:[#allocation7 + $0x64] ss:$8 sps:$4 sm:$0xff]  }
  0x44   :  { %654 = vmatprep.subr.bf16.mxu1 %v1244_v1  ;;  %612 = vmatpush1.bf16.msra.mxu0 %v1246_v2  ;;  %v1250_v5 = vld [vmem:[#allocation7 + $0x164] ss:$8 sps:$4 sm:$0xff]   ;;  %v1252_v6 = vld [vmem:[#allocation7 + $0x60] ss:$8 sps:$4 sm:$0xff]   ;;  %v1254_v8 = vld [vmem:[#allocation7 + $0x54] ss:$8 sps:$4 sm:$0xff]  }
  0x45   :  { %655 = vmatpush1.bf16.msra.mxu1 %v1247_v3  ;;  %613 = vmatprep.subr.bf16.mxu0 %v1248_v4  ;;  %v1253_v7 = vld [vmem:[#allocation7 + $0x160] ss:$8 sps:$4 sm:$0xff]   ;;  %v1256_v9 = vld [vmem:[#allocation7 + $0x154] ss:$8 sps:$4 sm:$0xff]   ;;  %v1258_v10 = vld [vmem:[#allocation7 + $0x50] ss:$8 sps:$4 sm:$0xff]  }
  0x46   :  { %656 = vmatprep.subr.bf16.mxu1 %v1250_v5  ;;  %v1259_v11 = vld [vmem:[#allocation7 + $0x150] ss:$8 sps:$4 sm:$0xff]   ;;  %v1260_v12 = vld [vmem:[#allocation7 + $0x44] ss:$8 sps:$4 sm:$0xff]   ;;  %v1264_v14 = vld [vmem:[#allocation7 + $0x40] ss:$8 sps:$4 sm:$0xff]  }
  0x47   :  { %v1262_v13 = vld [vmem:[#allocation7 + $0x144] ss:$8 sps:$4 sm:$0xff]   ;;  %v1265_v15 = vld [vmem:[#allocation7 + $0x140] ss:$8 sps:$4 sm:$0xff]   ;;  %v1266_v16 = vld [vmem:[#allocation7 + $0x34] ss:$8 sps:$4 sm:$0xff]  }
  0x48   :  { %614 = vmatpush1.bf16.msra.mxu0 %v1252_v6  ;;  %v1268_v17 = vld [vmem:[#allocation7 + $0x134] ss:$8 sps:$4 sm:$0xff]   ;;  %v1270_v18 = vld [vmem:[#allocation7 + $0x30] ss:$8 sps:$4 sm:$0xff]   ;;  %v1272_v20 = vld [vmem:[#allocation7 + $0x24] ss:$8 sps:$4 sm:$0xff]  }
  0x49   :  { %657 = vmatpush1.bf16.msra.mxu1 %v1253_v7  ;;  %615 = vmatprep.subr.bf16.mxu0 %v1254_v8  ;;  %v1271_v19 = vld [vmem:[#allocation7 + $0x130] ss:$8 sps:$4 sm:$0xff]   ;;  %v1274_v21 = vld [vmem:[#allocation7 + $0x124] ss:$8 sps:$4 sm:$0xff]   ;;  %v1276_v22 = vld [vmem:[#allocation7 + $0x20] ss:$8 sps:$4 sm:$0xff]  }
  0x4a   :  { %658 = vmatprep.subr.bf16.mxu1 %v1256_v9  ;;  %v1277_v23 = vld [vmem:[#allocation7 + $0x120] ss:$8 sps:$4 sm:$0xff]   ;;  %v1278_v24 = vld [vmem:[#allocation7 + $0x14] ss:$8 sps:$4 sm:$0xff]   ;;  %v1282_v26 = vld [vmem:[#allocation7 + $0x10] ss:$8 sps:$4 sm:$0xff]  }
  0x4b   :  { %v1280_v25 = vld [vmem:[#allocation7 + $0x114] ss:$8 sps:$4 sm:$0xff]   ;;  %v1283_v27 = vld [vmem:[#allocation7 + $0x110] ss:$8 sps:$4 sm:$0xff]   ;;  %v1284_v28 = vld [vmem:[#allocation7 + $0x4] ss:$8 sps:$4 sm:$0xff]  }
  0x4c   :  { %616 = vmatpush1.bf16.msra.mxu0 %v1258_v10  ;;  %v1286_v29 = vld [vmem:[#allocation7 + $0x104] ss:$8 sps:$4 sm:$0xff]   ;;  %v1288_v30 = vld [vmem:[#allocation7] ss:$8 sps:$4 sm:$0xff]   ;;  %v1290_v32 = vld [vmem:[#allocation7 + $0xf4] ss:$8 sps:$4 sm:$0xff]  }
  0x4d   :  { %659 = vmatpush1.bf16.msra.mxu1 %v1259_v11  ;;  %617 = vmatprep.subr.bf16.mxu0 %v1260_v12  ;;  %v1289_v31 = vld [vmem:[#allocation7 + $0x100] ss:$8 sps:$4 sm:$0xff]   ;;  %v1292_v33 = vld [vmem:[#allocation7 + $0x1f4] ss:$8 sps:$4 sm:$0xff]   ;;  %v1294_v34 = vld [vmem:[#allocation7 + $0xf0] ss:$8 sps:$4 sm:$0xff]  }
  0x4e   :  { %660 = vmatprep.subr.bf16.mxu1 %v1262_v13  ;;  %v1295_v35 = vld [vmem:[#allocation7 + $0x1f0] ss:$8 sps:$4 sm:$0xff]   ;;  %v1296_v36 = vld [vmem:[#allocation7 + $0xe4] ss:$8 sps:$4 sm:$0xff]   ;;  %v1300_v38 = vld [vmem:[#allocation7 + $0xe0] ss:$8 sps:$4 sm:$0xff]  }
  0x4f   :  { %v1298_v37 = vld [vmem:[#allocation7 + $0x1e4] ss:$8 sps:$4 sm:$0xff]   ;;  %v1301_v40 = vld [vmem:[#allocation7 + $0x1e0] ss:$8 sps:$4 sm:$0xff]   ;;  %v1302_v41 = vld [vmem:[#allocation7 + $0xd4] ss:$8 sps:$4 sm:$0xff]  }
  0x50   :  { %618 = vmatpush1.bf16.msra.mxu0 %v1264_v14  ;;  %v1304_v42 = vld [vmem:[#allocation7 + $0x1d4] ss:$8 sps:$4 sm:$0xff]   ;;  %v1306_v43 = vld [vmem:[#allocation7 + $0xd0] ss:$8 sps:$4 sm:$0xff]   ;;  %v1593_v45 = vshrl.u32 %v120_v39, 7  ;;  %v1515_v39 = vmov 0.0  }
  0x51   :  { %661 = vmatpush1.bf16.msra.mxu1 %v1265_v15  ;;  %619 = vmatprep.subr.bf16.mxu0 %v1266_v16  ;;  %v1307_v44 = vld [vmem:[#allocation7 + $0x1d0] ss:$8 sps:$4 sm:$0xff]   ;;  %v1308_v46 = vld [vmem:[#allocation7 + $0xc4] ss:$8 sps:$4 sm:$0xff]   ;;  %v1312_v48 = vld [vmem:[#allocation7 + $0xc0] ss:$8 sps:$4 sm:$0xff]  }
  0x52   :  { %662 = vmatprep.subr.bf16.mxu1 %v1268_v17  ;;  %v1310_v47 = vld [vmem:[#allocation7 + $0x1c4] ss:$8 sps:$4 sm:$0xff]   ;;  %v1313_v49 = vld [vmem:[#allocation7 + $0x1c0] ss:$8 sps:$4 sm:$0xff]   ;;  %v1314_v50 = vld [vmem:[#allocation7 + $0xb4] ss:$8 sps:$4 sm:$0xff]  }
  0x53   :  { %v1316_v51 = vld [vmem:[#allocation7 + $0x1b4] ss:$8 sps:$4 sm:$0xff]   ;;  %v1370_v52 = vld.sshfl [vmem:[#allocation2] sm:$0xff pattern:$0x76325410]  ;;  %vm1516_vm0 = vmmov 0  }
  0x54   :  { %620 = vmatpush1.bf16.msra.mxu0 %v1270_v18  ;;  %v1371_v53 = vld.sshfl [vmem:[#allocation2 + $0x8] sm:$0xff pattern:$0x76325410]  ;;  %v1318_v54 = vld [vmem:[#allocation7 + $0xb0] ss:$8 sps:$4 sm:$0xff]  }
  0x55   :  { %663 = vmatpush1.bf16.msra.mxu1 %v1271_v19  ;;  %621 = vmatprep.subr.bf16.mxu0 %v1272_v20  ;;  %v1319_v55 = vld [vmem:[#allocation7 + $0x1b0] ss:$8 sps:$4 sm:$0xff]   ;;  %v1320_v58 = vld [vmem:[#allocation7 + $0xa4] ss:$8 sps:$4 sm:$0xff]   ;;  %v132_v60 = vcombine.high %v1370_v52, %v1371_v53  ;;  %v1324_v63 = vld [vmem:[#allocation7 + $0xa0] ss:$8 sps:$4 sm:$0xff]   ;;  %v131_v16 = vcombine.low %v1370_v52, %v1371_v53 }
  0x56   :  { %664 = vmatprep.subr.bf16.mxu1 %v1274_v21  ;;  %v1372_v56 = vld.sshfl [vmem:[#allocation2 + $0x10] sm:$0xff pattern:$0x76325410]  ;;  %v1373_v57 = vld.sshfl [vmem:[#allocation2 + $0x18] sm:$0xff pattern:$0x76325410] }
  0x57   :  { %v1322_v59 = vld [vmem:[#allocation7 + $0x1a4] ss:$8 sps:$4 sm:$0xff]   ;;  %v150_v0 = vcombine.high %v1372_v56, %v1373_v57  ;;  %v1376_v1 = vld.sshfl [vmem:[#allocation5 + $0x10] sm:$0xff pattern:$0x76325410]  ;;  %v149_v17 = vcombine.low %v1372_v56, %v1373_v57  ;;  %v1346_v20 = vld [vmem:[#allocation8 + $0x78] sm:$0xff]  }
  0x58   :  { %622 = vmatpush1.bf16.msra.mxu0 %v1276_v22  ;;  %v1374_v61 = vld.sshfl [vmem:[#allocation5] sm:$0xff pattern:$0x76325410]  ;;  %v1375_v62 = vld.sshfl [vmem:[#allocation5 + $0x8] sm:$0xff pattern:$0x76325410] }
  0x59   :  { %665 = vmatpush1.bf16.msra.mxu1 %v1277_v23  ;;  %623 = vmatprep.subr.bf16.mxu0 %v1278_v24  ;;  %v1377_v2 = vld.sshfl [vmem:[#allocation5 + $0x18] sm:$0xff pattern:$0x76325410]  ;;  %v1325_v3 = vld [vmem:[#allocation7 + $0x1a0] ss:$8 sps:$4 sm:$0xff]   ;;  %v156_v5 = vpack.c.bf16 %v150_v0, %v132_v60  ;;  %v190_v7 = vcombine.high %v1374_v61, %v1375_v62  ;;  %v189_v18 = vcombine.low %v1374_v61, %v1375_v62  ;;  %v1348_v24 = vld [vmem:[#allocation8 + $0x70] sm:$0xff]  }
  0x5a   :  { %666 = vmatprep.subr.bf16.mxu1 %v1280_v25  ;;  %v1326_v4 = vld [vmem:[#allocation7 + $0x94] ss:$8 sps:$4 sm:$0xff]   ;;  %v1330_v8 = vld [vmem:[#allocation7 + $0x90] ss:$8 sps:$4 sm:$0xff]   ;;  %v208_v9 = vcombine.high %v1376_v1, %v1377_v2  ;;  %v1332_v11 = vld [vmem:[#allocation7 + $0x84] ss:$8 sps:$4 sm:$0xff]   ;;  %v207_v19 = vcombine.low %v1376_v1, %v1377_v2  ;;  %v155_v22 = vpack.c.bf16 %v149_v17, %v131_v16 }
  0x5b   :  { %v1328_v6 = vld [vmem:[#allocation7 + $0x194] ss:$8 sps:$4 sm:$0xff]   ;;  %643 = vmatprep.mubr.bf16.mxu0 %v156_v5  ;;  %v1331_v10 = vld [vmem:[#allocation7 + $0x190] ss:$8 sps:$4 sm:$0xff]   ;;  %v1334_v13 = vld [vmem:[#allocation7 + $0x184] ss:$8 sps:$4 sm:$0xff]  }
  0x5c   :  { %624 = vmatpush1.bf16.msra.mxu0 %v1282_v26  ;;  %v214_v12 = vpack.c.bf16 %v208_v9, %v190_v7  ;;  %v1336_v14 = vld [vmem:[#allocation7 + $0x80] ss:$8 sps:$4 sm:$0xff]   ;;  %v1347_v21 = vld [vmem:[#allocation8 + $0x38] sm:$0xff]   ;;  %v213_v23 = vpack.c.bf16 %v207_v19, %v189_v18  ;;  %v1349_v25 = vld [vmem:[#allocation8 + $0x30] sm:$0xff]  }
  0x5d   :  { %667 = vmatpush1.bf16.msra.mxu1 %v1283_v27  ;;  %625 = vmatprep.subr.bf16.mxu0 %v1284_v28  ;;  %v1337_v15 = vld [vmem:[#allocation7 + $0x180] ss:$8 sps:$4 sm:$0xff]   ;;  %v1366_v7 = vld [vmem:[#allocation10 + $0x18] sm:$0xff]  }
  0x5e   :  { %668 = vmatprep.subr.bf16.mxu1 %v1286_v29  ;;  %686 = vmatprep.mubr.bf16.mxu1 %v214_v12  ;;  %v1350_v26 = vld [vmem:[#allocation8 + $0x68] sm:$0xff]   ;;  %v1352_v28 = vld [vmem:[#allocation8 + $0x60] sm:$0xff]  }
  0x5f   :  { %v1351_v27 = vld [vmem:[#allocation8 + $0x28] sm:$0xff]   ;;  %v1353_v29 = vld [vmem:[#allocation8 + $0x20] sm:$0xff]  }
  0x60   :  { %626 = vmatpush1.bf16.msra.mxu0 %v1288_v30  ;;  %v1354_v30 = vld [vmem:[#allocation8 + $0x58] sm:$0xff]   ;;  %v1368_v9 = vld [vmem:[#allocation10 + $0x8] sm:$0xff]  }
  0x61   :  { %669 = vmatpush1.bf16.msra.mxu1 %v1289_v31  ;;  %627 = vmatprep.subr.bf16.mxu0 %v1290_v32  ;;  %v1355_v31 = vld [vmem:[#allocation8 + $0x18] sm:$0xff]   ;;  %v1356_v32 = vld [vmem:[#allocation8 + $0x50] sm:$0xff]  }
  0x62   :  { %670 = vmatprep.subr.bf16.mxu1 %v1292_v33  ;;  %v1357_v33 = vld [vmem:[#allocation8 + $0x10] sm:$0xff]  }
  0x64   :  { %628 = vmatpush2.bf16.msra.mxu0 %v1294_v34  ;;  %v1358_v34 = vld [vmem:[#allocation8 + $0x48] sm:$0xff]  }
  0x65   :  { %671 = vmatpush2.bf16.msra.mxu1 %v1295_v35  ;;  %629 = vmatprep.subr.bf16.mxu0 %v1296_v36  ;;  %v1359_v35 = vld [vmem:[#allocation8 + $0x8] sm:$0xff]   ;;  %v1360_v36 = vld [vmem:[#allocation8 + $0x40] sm:$0xff]  }
  0x66   :  { %672 = vmatprep.subr.bf16.mxu1 %v1298_v37  ;;  %v1361_v37 = vld [vmem:[#allocation8] sm:$0xff]  }
  0x68   :  { %630 = vmatpush2.bf16.msra.mxu0 %v1300_v38  ;;  %v1362_v38 = vld [vmem:[#allocation10 + $0x38] sm:$0xff]  }
  0x69   :  { %673 = vmatpush2.bf16.msra.mxu1 %v1301_v40  ;;  %631 = vmatprep.subr.bf16.mxu0 %v1302_v41  ;;  %v1363_v40 = vld [vmem:[#allocation10 + $0x30] sm:$0xff]   ;;  %v1364_v41 = vld [vmem:[#allocation10 + $0x28] sm:$0xff]  }
  0x6a   :  { %674 = vmatprep.subr.bf16.mxu1 %v1304_v42  ;;  %v1365_v42 = vld [vmem:[#allocation10 + $0x20] sm:$0xff]  }
  0x6c   :  { %632 = vmatpush2.bf16.msra.mxu0 %v1306_v43  ;;  %v287_v43 = vsub.s32 1, %v1593_v45 }
  0x6d   :  { %675 = vmatpush2.bf16.msra.mxu1 %v1307_v44  ;;  %633 = vmatprep.subr.bf16.mxu0 %v1308_v46  ;;  %v283_v44 = vsub.s32 0, %v1593_v45  ;;  %v279_v46 = vld [vmem:[%s1613_s3] sm:$0x3] }
  0x6e   :  { %676 = vmatprep.subr.bf16.mxu1 %v1310_v47  ;;  %v288_v47 = vrot.slane %v279_v46, %v287_v43 }
  0x70   :  { %634 = vmatpush2.bf16.msra.mxu0 %v1312_v48  ;;  %v284_v48 = vrot.slane %v279_v46, %v283_v44 }
  0x71   :  { %677 = vmatpush2.bf16.msra.mxu1 %v1313_v49  ;;  %635 = vmatprep.subr.bf16.mxu0 %v1314_v50 }
  0x72   :  { %678 = vmatprep.subr.bf16.mxu1 %v1316_v51 }
  0x74   :  { %636 = vmatpush2.bf16.msra.mxu0 %v1318_v54 }
  0x75   :  { %679 = vmatpush2.bf16.msra.mxu1 %v1319_v55  ;;  %637 = vmatprep.subr.bf16.mxu0 %v1320_v58 }
  0x76   :  { %680 = vmatprep.subr.bf16.mxu1 %v1322_v59 }
  0x78   :  { %638 = vmatpush2.bf16.msra.mxu0 %v1324_v63 }
  0x79   :  { %681 = vmatpush2.bf16.msra.mxu1 %v1325_v3  ;;  %639 = vmatprep.subr.bf16.mxu0 %v1326_v4 }
  0x7a   :  { %682 = vmatprep.subr.bf16.mxu1 %v1328_v6 }
  0x7c   :  { %640 = vmatpush2.bf16.msra.mxu0 %v1330_v8  ;;  %v1367_v8 = vld [vmem:[#allocation10 + $0x10] sm:$0xff]  }
  0x7d   :  { %683 = vmatpush2.bf16.msra.mxu1 %v1331_v10  ;;  %641 = vmatprep.subr.bf16.mxu0 %v1332_v11  ;;  %v1369_v10 = vld [vmem:[#allocation10] sm:$0xff]  }
  0x7e   :  { %684 = vmatprep.subr.bf16.mxu1 %v1334_v13 }
  0x80   :  { %642 = vmatpush2.bf16.msra.mxu0 %v1336_v14  ;;  %v1144_v14 = vld [vmem:[%s1615_s5] ss:$0 sm:$0xff] }
  0x81   :  { %685 = vmatpush2.bf16.msra.mxu1 %v1337_v15  ;;  %1175 = vmatprep.subr.bf16.mxu0 %v1346_v20 }
  0x82   :  { %1206 = vmatprep.subr.bf16.mxu1 %v1515_v39 }
  0x83   :  { %644 = vmatmul.mubr.bf16.vlgmr.msra.gmra.mxu0 %v155_v22 }
  0x84   :  { %687 = vmatmul.mubr.bf16.vlgmr.msra.gmra.mxu1 %v213_v23  ;;  %1176 = vmatpush3.bf16.msra.mxu0 %v1347_v21  ;;  %v1517_v23 = vmov 1966171168  }
  0x85   :  { %1177 = vmatprep.subr.bf16.mxu0 %v1348_v24  ;;  %1207 = vmatpush3.bf16.msra.mxu1 %v1362_v38  ;;  %v998_v24 = vunpack.c.l.s4 %v1517_v23 }
  0x86   :  { %1208 = vmatprep.subr.bf16.mxu1 %v1515_v39  ;;  %1222 = vmatprep.mubr.msk.bf16.mxu1 %vm1516_vm0, %v1515_v39 }
  0x88   :  { %1178 = vmatpush3.bf16.msra.mxu0 %v1349_v25 }
  0x89   :  { %1179 = vmatprep.subr.bf16.mxu0 %v1350_v26  ;;  %1209 = vmatpush3.bf16.msra.mxu1 %v1363_v40  ;;  %v999_v26 = vunpack.c.0.s8 %v998_v24 }
  0x8a   :  { %1210 = vmatprep.subr.bf16.mxu1 %v1515_v39 }
  0x8c   :  { %1180 = vmatpush3.bf16.msra.mxu0 %v1351_v27  ;;  %v1161_v27 = vld [vmem:[%s1617_s7] ss:$0 sm:$0xff] }
  0x8d   :  { %1181 = vmatprep.subr.bf16.mxu0 %v1352_v28  ;;  %1211 = vmatpush3.bf16.msra.mxu1 %v1364_v41 }
  0x8e   :  { %1212 = vmatprep.subr.bf16.mxu1 %v1515_v39 }
  0x90   :  { %1182 = vmatpush3.bf16.msra.mxu0 %v1353_v29 }
  0x91   :  { %1183 = vmatprep.subr.bf16.mxu0 %v1354_v30  ;;  %1213 = vmatpush3.bf16.msra.mxu1 %v1365_v42 }
  0x92   :  { %1214 = vmatprep.subr.bf16.mxu1 %v1515_v39 }
  0x94   :  { %1184 = vmatpush3.bf16.msra.mxu0 %v1355_v31 }
  0x95   :  { %1185 = vmatprep.subr.bf16.mxu0 %v1356_v32  ;;  %1215 = vmatpush3.bf16.msra.mxu1 %v1366_v7  ;;  %v1002_v32 = vsub.s32 %v999_v26, %v1593_v45 }
  0x96   :  { %1216 = vmatprep.subr.bf16.mxu1 %v1515_v39 }
  0x98   :  { %1186 = vmatpush3.bf16.msra.mxu0 %v1357_v33 }
  0x99   :  { %1187 = vmatprep.subr.bf16.mxu0 %v1358_v34  ;;  %1217 = vmatpush3.bf16.msra.mxu1 %v1367_v8 }
  0x9a   :  { %1218 = vmatprep.subr.bf16.mxu1 %v1515_v39 }
  0x9c   :  { %1188 = vmatpush3.bf16.msra.mxu0 %v1359_v35 }
  0x9d   :  { %1189 = vmatprep.subr.bf16.mxu0 %v1360_v36  ;;  %1219 = vmatpush3.bf16.msra.mxu1 %v1368_v9 }
  0x9e   :  { %1220 = vmatprep.subr.bf16.mxu1 %v1515_v39 }
  0xa0   :  { %1190 = vmatpush3.bf16.msra.mxu0 %v1361_v37 }
  0xa1   :  { %1221 = vmatpush3.bf16.msra.mxu1 %v1369_v10 }
 0x143   :  { %v645_v49 = vpop.f32.mrf.mxu0 }
 0x144   :  { %v688_v50 = vpop.f32.mrf.mxu1  ;;  %v646_v54 = vadd.f32 %v645_v49, %v284_v48 }
 0x145   :  { %v647_v51 = vpop.f32.mrf.mxu0 }
 0x146   :  { %v690_v52 = vpop.f32.mrf.mxu1  ;;  %v648_v53 = vadd.f32 %v647_v51, %v288_v47  ;;  %v689_v62 = vadd.f32 %v688_v50, %v646_v54 }
 0x147   :  { %v649_v55 = vpop.f32.mrf.mxu0 }
 0x148   :  { %v692_v56 = vpop.f32.mrf.mxu1  ;;  %v650_v57 = vadd.f32 %v649_v55, %v284_v48  ;;  %v691_v59 = vadd.f32 %v690_v52, %v648_v53  ;;  %v697_v4 = vmax.f32 %v689_v62, 0.0 }
 0x149   :  { %v651_v58 = vpop.f32.mrf.mxu0 }
 0x14a   :  { %v693_v60 = vadd.f32 %v692_v56, %v650_v57  ;;  %v652_v61 = vadd.f32 %v651_v58, %v288_v47  ;;  %v694_v63 = vpop.f32.mrf.mxu1  ;;  %v698_v2 = vmax.f32 %v691_v59, 0.0 }
 0x14c   :  { %v695_v0 = vadd.f32 %v694_v63, %v652_v61  ;;  %v699_v1 = vmax.f32 %v693_v60, 0.0 }
 0x14e   :  { %v700_v3 = vmax.f32 %v695_v0, 0.0  ;;  %v701_v6 = vpack.c.bf16 %v699_v1, %v697_v4 }
 0x150   :  { %v702_v5 = vpack.c.bf16 %v700_v3, %v698_v2 }
 0x152   :  { %870 = vmatprep.mubr.bf16.mxu0 %v702_v5 }
 0x153   :  { %871 = vmatmul.mubr.bf16.vlgmr.msra.gmra.mxu0 %v701_v6 }
 0x213   :  { %v1191_v11 = vpop.f32.mrf.mxu0 }
 0x215   :  { %v1192_v12 = vpop.f32.mrf.mxu0 }
 0x216   :  { %v1193_v13 = vadd.f32 %v1192_v12, %v1191_v11 }
 0x217   :  { %v1194_v15 = vpop.f32.mrf.mxu0 }
 0x218   :  { %v873_v17 = vadd.f32 %v1193_v13, %v1144_v14 }
 0x219   :  { %v1195_v16 = vpop.f32.mrf.mxu0 }
 0x21a   :  { %v1196_v18 = vadd.f32 %v1195_v16, %v1194_v15  ;;  %v879_v20 = vmax.f32 %v873_v17, 0.0 }
 0x21c   :  { %v876_v19 = vadd.f32 %v1196_v18, %v1144_v14 }
 0x21e   :  { %v880_v21 = vmax.f32 %v876_v19, 0.0 }
 0x220   :  { %v881_v22 = vpack.c.bf16 %v880_v21, %v879_v20 }
 0x222   :  { %1223 = vmatmul.mubr.bf16.vlgmr.msra.gmra.mxu1 %v881_v22 }
 0x2e2   :  { %v987_v25 = vpop.f32.mrf.mxu1 }
 0x2e3   :  { %v988_v30 = vadd.f32 %v1161_v27, %v987_v25 }
 0x2e4   :  { %v1224_v28 = vpop.f32.mrf.mxu1 }
 0x2e6   :  { %v990_v29 = vpop.f32.mrf.mxu1 }
 0x2e7   :  { %v991_v31 = vadd.f32 %v1161_v27, %v990_v29 }
 0x2e8   :  { %v1225_v33 = vpop.f32.mrf.mxu1 }
 0x2e9   :  { %v994_v34 = vpack.c.bf16 %v991_v31, %v988_v30  ;;  %v1170_v35 = vpack.c.bf16 %v991_v31, %v991_v31 }
 0x2eb   :  { %v1003_v36 = vrot.slane %v994_v34, %v1002_v32  ;;  %v1010_v37 = vrot.slane %v1170_v35, %v1002_v32 }
 0x2ed   :  { %v1011_v38 = vcombine.high %v1003_v36, %v1003_v36  ;;  %v1012_v39 = vcombine.high %v1010_v37, %v1010_v37  ;;  %v1019_v40 = vrot.slane %v1003_v36, %v1002_v32  ;;  %v1026_v41 = vrot.slane %v1010_v37, %v1002_v32  ;;  %1171 = vst.sshfl [vmem:[#allocation11] sm:$0x1 pattern:$0x73625140] %v1003_v36 }
 0x2ee   :  { %1173 = vst.sshfl [vmem:[#allocation11 + $0x4] sm:$0x1 pattern:$0x73625140] %v1010_v37 }
 0x2ef   :  { %v1033_v42 = vrot.slane %v1011_v38, %v1002_v32  ;;  %v1040_v43 = vrot.slane %v1012_v39, %v1002_v32  ;;  %v1041_v44 = vcombine.high %v1019_v40, %v1019_v40  ;;  %v1042_v46 = vcombine.high %v1026_v41, %v1026_v41  ;;  %1172 = vst.sshfl [vmem:[#allocation11 + $0x1] sm:$0x1 pattern:$0x73625140] %v1011_v38 }
 0x2f0   :  { %1174 = vst.sshfl [vmem:[#allocation11 + $0x5] sm:$0x1 pattern:$0x73625140] %v1012_v39 }
 0x2f1   :  { %v1043_v47 = vcombine.high %v1033_v42, %v1033_v42  ;;  %v1044_v48 = vcombine.high %v1040_v43, %v1040_v43  ;;  %1055 = vst [vmem:[#allocation11 + $0x2] sm:$0x1] %v1041_v44  ;;  %1059 = vst [vmem:[#allocation11 + $0x6] sm:$0x1] %v1042_v46 }
 0x2f3   :  { %1056 = vst [vmem:[#allocation11 + $0x3] sm:$0x1] %v1043_v47  ;;  %1060 = vst [vmem:[#allocation11 + $0x7] sm:$0x1] %v1044_v48 }
 0x2f4   :  { %1065 = vsyncadd [#allocation4], 112  ;;  %s1518_s5 = smov [#allocation11]  }
 0x2f5   :  { %s1066_s7 = sshll.u32 %s1518_s5, 4  ;;  %s1067_s7 = int_to_ptr.vmem [resolvable:$true] %s1066_s7 }
 0x2f6   :  { %s1478_s14 = scalar_lea.vmem %s1067_s7, 16  ;;  %s1482_s15 = scalar_lea.vmem %s1067_s7, 128 }
 0x2f7   :  { %p1479_p11 = scmp.ne.s32.totalorder %s1067_s7, %s1478_s14  ;;  %p1483_p12 = scmp.lt.s32.totalorder %s1067_s7, %s1067_s7 }
 0x2f8   :  { %p1484_p13 = scmp.lt.s32.totalorder %s1482_s15, %s1478_s14 }
 0x2fa   :  { %p1485_p0 = por %p1484_p13, %p1483_p12 }
 0x2fc   :  { %p1486_p1 = pnand %p1485_p0, %p1479_p11 }
 0x2fe   :  { %1489 = shalt.err (!%p1486_p1)
}
 0x2ff   :  { %s1519_s16 = smov 16   ;;  %s1520_s17 = smov 1  }
 0x300   :  { %1072 = dma.vmem_to_hbm [thread:$0]  %s1067_s7, 16, %s1618_s8, [#allocation4], %s1519_s16, %s1519_s16, %s1520_s17  }
 0x301   :  { %1504 = dma.done.wait [#allocation4], 128  }
 0x302   :  { %1505 = vsyncadd [#allocation4], 4294967168 }
 0x303   :  { %1076 = vsyncpa [#allocation3], 1 }
 0x304   :  { %1077 = vsyncpa [#allocation6], 1 }
 0x305   :  { %1078 = vsyncpa [#allocation9], 1 }
 0x306   :  { %1079 = vsyncpa [#allocation4], 1 }

</bundles_post_ra>
